<compile_context>
chip_gen: v7x
topology: tpu7x:2x2x1
jax: 0.10.0
libtpu: 0.0.40
codegen_flags: <defaults>
</compile_context>

<pallas_src>
import functools

import jax
import jax.numpy as jnp
from jax import lax
from jax.experimental import pallas as pl
from jax.experimental.pallas import tpu as pltpu

_NEG = -1e30        # pad value for the 3 extra relation-logit lanes (exp -> exactly 0)
_REL_TILE = 512     # cap on relation rows per grid step (sized for v7x's 64 MiB VMEM)


def _postproc_kernel(obj_ref, rel_ref, pair_ref, obj_out_ref, rel_out_ref,
                     *, num_rel_classes):
    cr = num_rel_classes

    # ---------------- object branch (whole image block; small, recomputed per rel
    # tile so the T grid axis can revisit the same output block safely) ----------------
    ol = obj_ref[0].astype(jnp.float32)                      # (N, C)
    n, c = ol.shape
    ocol = lax.broadcasted_iota(jnp.int32, (n, c), 1)        # reused: mask + argmax
    oe = jnp.exp(ol - jnp.max(ol, axis=-1, keepdims=True))
    oprob = oe / jnp.sum(oe, axis=-1, keepdims=True)         # exact softmax (torch parity)
    omask = jnp.where(ocol == 0, -1.0, oprob)                # exclude background class 0
    obj_scores = jnp.max(omask, axis=-1, keepdims=True)      # (N, 1)
    obj_pred = jnp.min(jnp.where(omask == obj_scores, ocol, c),
                       axis=-1, keepdims=True)               # (N, 1), +1 offset built in
    oc2 = lax.broadcasted_iota(jnp.int32, (n, 2), 1)
    # col0 = score, col1 = label (as f32; exact for labels < 2^24)
    obj_out_ref[0] = jnp.where(oc2 == 0, obj_scores, obj_pred.astype(jnp.float32))

    # ---------------- relation branch (one TR-row tile; lane dim = Cr + 3) ----------------
    rl = rel_ref[0].astype(jnp.float32)                      # (TR, W) with W = Cr + 3
    tr, w = rl.shape
    rcol = lax.broadcasted_iota(jnp.int32, (tr, w), 1)       # reused: mask, argmax, aux cols
    re_ = jnp.exp(rl - jnp.max(rl, axis=-1, keepdims=True))  # padded lanes -> exactly 0
    rprob = re_ / jnp.sum(re_, axis=-1, keepdims=True)       # rel_class_prob (exact)
    rmask = jnp.where((rcol == 0) | (rcol >= cr), -1.0, rprob)
    rel_scores = jnp.max(rmask, axis=-1, keepdims=True)      # (TR, 1)
    rel_class = jnp.min(jnp.where(rmask == rel_scores, rcol, w),
                        axis=-1, keepdims=True).astype(jnp.float32)

    # obj-score gather: ONE fused one-hot matmul on the MXU (both pair endpoints at once)
    pair = pair_ref[0]                                       # (TR, 2) int32
    gcol = lax.broadcasted_iota(jnp.int32, (tr, n), 1)       # single iota for both compares
    onehot = jnp.concatenate(
        [(gcol == pair[:, 0:1]).astype(jnp.float32),
         (gcol == pair[:, 1:2]).astype(jnp.float32)], axis=0)            # (2*TR, N)
    s01 = jnp.dot(onehot, obj_scores, preferred_element_type=jnp.float32)  # (2*TR, 1)
    triple = rel_scores * s01[:tr] * s01[tr:]                # (TR, 1)

    # merged output: cols [0, cr) = softmax probs, col cr = rel_scores,
    # col cr+1 = rel_class, col cr+2 = triple  -> single HBM write stream
    rel_out_ref[0] = jnp.where(
        rcol == cr, rel_scores,
        jnp.where(rcol == cr + 1, rel_class,
                  jnp.where(rcol == cr + 2, triple, rprob)))


def _fused_call(obj_logits, rel_logits_p, rel_pairs, *, rel_tile):
    B, N, C = obj_logits.shape
    _, R, W = rel_logits_p.shape
    cr = W - 3
    T = R // rel_tile
    kernel = functools.partial(_postproc_kernel, num_rel_classes=cr)
    return pl.pallas_call(
        kernel,
        grid=(B, T),
        in_specs=[
            pl.BlockSpec((1, N, C), lambda b, t: (b, 0, 0)),          # whole-image obj block
            pl.BlockSpec((1, rel_tile, W), lambda b, t: (b, t, 0)),   # rel row tile
            pl.BlockSpec((1, rel_tile, 2), lambda b, t: (b, t, 0)),   # pair idx row tile
        ],
        out_specs=(
            pl.BlockSpec((1, N, 2), lambda b, t: (b, 0, 0)),          # revisited across t
            pl.BlockSpec((1, rel_tile, W), lambda b, t: (b, t, 0)),
        ),
        out_shape=(
            jax.ShapeDtypeStruct((B, N, 2), jnp.float32),
            jax.ShapeDtypeStruct((B, R, W), jnp.float32),
        ),
        compiler_params=pltpu.CompilerParams(
            # image axis parallel (megacore); rel-tile axis arbitrary because the obj
            # output block is revisited across it.
            dimension_semantics=("parallel", "arbitrary"),
            vmem_limit_bytes=32 * 1024 * 1024),
    )(obj_logits, rel_logits_p, rel_pairs)


@functools.partial(jax.jit, static_argnames=("rel_tile",))
def _batched_postprocess(obj_logits, rel_logits_p, rel_pairs, rel_scale, rel_tile):
    W = rel_logits_p.shape[-1]
    cr = W - 3
    obj_out, rel_out = _fused_call(obj_logits, rel_logits_p, rel_pairs, rel_tile=rel_tile)
    obj_scores = obj_out[:, :, 0]                            # (B, N)
    obj_pred = obj_out[:, :, 1].astype(jnp.int32)            # (B, N)
    rel_prob = rel_out[:, :, :cr]                            # (B, R, Cr)
    rel_class = rel_out[:, :, cr + 1].astype(jnp.int32)      # (B, R)
    triple = rel_out[:, :, cr + 2] * rel_scale               # (B, R)

    # TODO(synk): the descending sort + reorder is XLA glue (no Pallas TPU sort
    # primitive); the rel_prob reorder could be folded into a second Pallas gather
    # (PrefetchScalarGridSpec + pl.Element row gather) to save one HBM round trip.
    order = jnp.argsort(-triple, axis=-1)
    pair_sorted = jnp.take_along_axis(rel_pairs, order[..., None], axis=1)
    prob_sorted = jnp.take_along_axis(rel_prob, order[..., None], axis=1)
    labels_sorted = jnp.take_along_axis(rel_class, order, axis=1)
    return obj_scores, obj_pred, pair_sorted, prob_sorted, labels_sorted


def post_processor_forward(relation_logits, refine_obj_logits, rel_pair_idxs, boxes,
                           add_data=None, rel_tile=_REL_TILE):
    """use_gt_box=True, attribute_on=False configuration of PostProcessor.forward."""
    # TODO(synk): obj_prediction_nms (use_gt_box=False branch) and the attribute
    # sigmoid path (attribute_on=True) are not implemented.
    if add_data is None:
        add_data = {}
    # TODO(synk): images are batched into one pallas_call assuming uniform per-image
    # shapes; ragged images would need padding + masking of the padded rows so they
    # cannot pollute the triple-score sort.
    obj_logits = jnp.stack(refine_obj_logits)                 # (B, N, C_obj)
    rel_logits = jnp.stack(relation_logits)                   # (B, R, C_rel)
    rel_pairs = jnp.stack(rel_pair_idxs).astype(jnp.int32)    # (B, R, 2)
    B, R, _ = rel_logits.shape

    # Pad the relation-logit lane dim by 3 so the kernel can emit probs + the
    # (rel_score, rel_class, triple) stats as ONE merged output stream.  exp() of the
    # -1e30 pad underflows to exactly 0, so the softmax rows are unchanged.
    rel_logits_p = jnp.pad(rel_logits, ((0, 0), (0, 0), (0, 3)), constant_values=_NEG)

    # Relation row tile: <= rel_tile rows per grid step (VMEM-safe on v7x).
    tile = rel_tile if (R % rel_tile == 0) else R   # TODO(synk): pad + mask ragged R

    if 'rel_score' in add_data:
        # NOTE: 'rel_score' key check vs 'rel_scores' read mirrors the original torch code.
        rel_scale = jnp.stack(add_data['rel_scores']).astype(jnp.float32)
    else:
        rel_scale = jnp.ones((B, R), jnp.float32)

    (obj_scores, obj_pred, pair_sorted, prob_sorted,
     labels_sorted) = _batched_postprocess(obj_logits, rel_logits_p, rel_pairs,
                                           rel_scale, tile)

    results = []
    for i, box in enumerate(boxes):
        results.append({
            'boxes': box,                              # use_gt_box=True -> reference boxes
            'pred_labels': obj_pred[i],
            'pred_scores': obj_scores[i],
            'rel_pair_idxs': pair_sorted[i],
            'pred_rel_scores': prob_sorted[i],
            'pred_rel_labels': labels_sorted[i],
        })
    return results


if __name__ == "__main__":
    key = jax.random.PRNGKey(0)
    num_images = 2
    n_obj, c_obj = 8, 16      # objects per image, object classes (incl. background)
    n_rel, c_rel = 16, 32     # relation pairs per image, relation classes (incl. background)

    relation_logits, refine_obj_logits, rel_pair_idxs, boxes = [], [], [], []
    for _ in range(num_images):
        key, k1, k2, k3, k4 = jax.random.split(key, 5)
        relation_logits.append(jax.random.normal(k1, (n_rel, c_rel), jnp.float32))
        refine_obj_logits.append(jax.random.normal(k2, (n_obj, c_obj), jnp.float32))
        rel_pair_idxs.append(jax.random.randint(k3, (n_rel, 2), 0, n_obj, jnp.int32))
        boxes.append(jax.random.uniform(k4, (n_obj, 4), jnp.float32) * 100.0)

    results = post_processor_forward(relation_logits, refine_obj_logits,
                                     rel_pair_idxs, boxes)
    for r in results:
        for v in r.values():
            jax.block_until_ready(v)

    # sanity checks against a pure-JAX reference (exact softmax now -> tight tolerances)
    for i in range(num_images):
        ref_oprob = jax.nn.softmax(refine_obj_logits[i], axis=-1)
        ref_oscores = ref_oprob[:, 1:].max(axis=1)
        ref_opred = ref_oprob[:, 1:].argmax(axis=1) + 1
        assert jnp.allclose(results[i]['pred_scores'], ref_oscores, atol=1e-5)
        assert jnp.array_equal(results[i]['pred_labels'], ref_opred)

        ref_rprob = jax.nn.softmax(relation_logits[i], axis=-1)
        ref_rscores = ref_rprob[:, 1:].max(axis=1)
        ref_rclass = ref_rprob[:, 1:].argmax(axis=1) + 1
        s0 = ref_oscores[rel_pair_idxs[i][:, 0]]
        s1 = ref_oscores[rel_pair_idxs[i][:, 1]]
        ref_triple = ref_rscores * s0 * s1
        order = jnp.argsort(-ref_triple)
        assert jnp.allclose(results[i]['pred_rel_scores'], ref_rprob[order], atol=1e-5)
        assert jnp.allclose(results[i]['pred_rel_scores'].sum(-1), 1.0, atol=1e-5)
        assert jnp.array_equal(results[i]['pred_rel_labels'], ref_rclass[order])
        assert jnp.array_equal(results[i]['rel_pair_idxs'], rel_pair_idxs[i][order])

    print("KERNEL_OK")
</pallas_src>

<mosaic_0001>
module attributes {stable_mosaic.version = 11 : i64} {
  func.func @_postproc_kernel(%arg0: i32, %arg1: i32, %arg2: memref<1x8x16xf32, #tpu.memory_space<vmem>>, %arg3: memref<1x16x35xf32, #tpu.memory_space<vmem>>, %arg4: memref<1x16x2xi32, #tpu.memory_space<vmem>>, %arg5: memref<1x8x2xf32, #tpu.memory_space<vmem>>, %arg6: memref<1x16x35xf32, #tpu.memory_space<vmem>>) attributes {dimension_semantics = [#tpu.dimension_semantics<parallel>, #tpu.dimension_semantics<arbitrary>], iteration_bounds = array<i64: 2, 1>, scalar_prefetch = 0 : i64, scratch_operands = 0 : i64, tpu.core_type = #tpu.core_type<tc>, window_params = [{transform_indices = @transform_0, window_bounds = array<i64: 1, 8, 16>}, {transform_indices = @transform_1, window_bounds = array<i64: 1, 16, 35>}, {transform_indices = @transform_2, window_bounds = array<i64: 1, 16, 2>}, {transform_indices = @transform_3, window_bounds = array<i64: 1, 8, 2>}, {transform_indices = @transform_4, window_bounds = array<i64: 1, 16, 35>}]} {
    %c0 = arith.constant 0 : index
    %c0_0 = arith.constant 0 : index
    %c0_1 = arith.constant 0 : index
    %0 = vector.load %arg2[%c0, %c0_0, %c0_1] : memref<1x8x16xf32, #tpu.memory_space<vmem>>, vector<1x8x16xf32>
    %1 = vector.shape_cast %0 : vector<1x8x16xf32> to vector<8x16xf32>
    %2 = tpu.iota {dimensions = array<i32: 1>} : vector<8x16xi32>
    %cst = arith.constant dense<0xFF800000> : vector<8xf32>
    %3 = vector.multi_reduction <maximumf>, %1, %cst [1] : vector<8x16xf32> to vector<8xf32>
    %4 = vector.shape_cast %3 : vector<8xf32> to vector<8x1xf32>
    %5 = vector.broadcast %4 : vector<8x1xf32> to vector<8x16xf32>
    %6 = arith.subf %1, %5 : vector<8x16xf32>
    %7 = math.exp %6 : vector<8x16xf32>
    %cst_2 = arith.constant dense<0.000000e+00> : vector<8xf32>
    %8 = vector.multi_reduction <add>, %7, %cst_2 [1] : vector<8x16xf32> to vector<8xf32>
    %9 = vector.shape_cast %8 : vector<8xf32> to vector<8x1xf32>
    %10 = vector.broadcast %9 : vector<8x1xf32> to vector<8x16xf32>
    %11 = arith.divf %7, %10 : vector<8x16xf32>
    %c0_i32 = arith.constant 0 : i32
    %12 = vector.broadcast %c0_i32 : i32 to vector<8x16xi32>
    %13 = arith.cmpi eq, %2, %12 : vector<8x16xi32>
    %cst_3 = arith.constant -1.000000e+00 : f32
    %14 = vector.broadcast %cst_3 : f32 to vector<8x16xf32>
    %15 = arith.select %13, %14, %11 : vector<8x16xi1>, vector<8x16xf32>
    %cst_4 = arith.constant dense<0xFF800000> : vector<8xf32>
    %16 = vector.multi_reduction <maximumf>, %15, %cst_4 [1] : vector<8x16xf32> to vector<8xf32>
    %17 = vector.shape_cast %16 : vector<8xf32> to vector<8x1xf32>
    %18 = vector.broadcast %17 : vector<8x1xf32> to vector<8x16xf32>
    %19 = arith.cmpf oeq, %15, %18 : vector<8x16xf32>
    %c16_i32 = arith.constant 16 : i32
    %20 = vector.broadcast %c16_i32 : i32 to vector<8x16xi32>
    %21 = arith.select %19, %2, %20 : vector<8x16xi1>, vector<8x16xi32>
    %cst_5 = arith.constant dense<2147483647> : vector<8xi32>
    %22 = vector.multi_reduction <minsi>, %21, %cst_5 [1] : vector<8x16xi32> to vector<8xi32>
    %23 = vector.shape_cast %22 : vector<8xi32> to vector<8x1xi32>
    %24 = tpu.iota {dimensions = array<i32: 1>} : vector<8x2xi32>
    %c0_i32_6 = arith.constant 0 : i32
    %25 = vector.broadcast %c0_i32_6 : i32 to vector<8x2xi32>
    %26 = arith.cmpi eq, %24, %25 : vector<8x2xi32>
    %27 = arith.sitofp %23 : vector<8x1xi32> to vector<8x1xf32>
    %28 = vector.shape_cast %17 : vector<8x1xf32> to vector<8x1xf32>
    %29 = vector.broadcast %28 : vector<8x1xf32> to vector<8x2xf32>
    %30 = vector.shape_cast %27 : vector<8x1xf32> to vector<8x1xf32>
    %31 = vector.broadcast %30 : vector<8x1xf32> to vector<8x2xf32>
    %32 = arith.select %26, %29, %31 : vector<8x2xi1>, vector<8x2xf32>
    %c0_7 = arith.constant 0 : index
    %c0_8 = arith.constant 0 : index
    %c0_9 = arith.constant 0 : index
    %33 = vector.load %arg5[%c0_7, %c0_8, %c0_9] : memref<1x8x2xf32, #tpu.memory_space<vmem>>, vector<1x8x2xf32>
    %34 = vector.shape_cast %33 : vector<1x8x2xf32> to vector<8x2xf32>
    %35 = vector.shape_cast %32 : vector<8x2xf32> to vector<1x8x2xf32>
    tpu.vector_store %arg5[%c0_7, %c0_8, %c0_9], %35 {strides = array<i32>} : memref<1x8x2xf32, #tpu.memory_space<vmem>>, vector<1x8x2xf32>,
    %c0_10 = arith.constant 0 : index
    %c0_11 = arith.constant 0 : index
    %c0_12 = arith.constant 0 : index
    %36 = vector.load %arg3[%c0_10, %c0_11, %c0_12] : memref<1x16x35xf32, #tpu.memory_space<vmem>>, vector<1x16x35xf32>
    %37 = vector.shape_cast %36 : vector<1x16x35xf32> to vector<16x35xf32>
    %38 = tpu.iota {dimensions = array<i32: 1>} : vector<16x35xi32>
    %cst_13 = arith.constant dense<0xFF800000> : vector<16xf32>
    %39 = vector.multi_reduction <maximumf>, %37, %cst_13 [1] : vector<16x35xf32> to vector<16xf32>
    %40 = vector.shape_cast %39 : vector<16xf32> to vector<16x1xf32>
    %41 = vector.broadcast %40 : vector<16x1xf32> to vector<16x35xf32>
    %42 = arith.subf %37, %41 : vector<16x35xf32>
    %43 = math.exp %42 : vector<16x35xf32>
    %cst_14 = arith.constant dense<0.000000e+00> : vector<16xf32>
    %44 = vector.multi_reduction <add>, %43, %cst_14 [1] : vector<16x35xf32> to vector<16xf32>
    %45 = vector.shape_cast %44 : vector<16xf32> to vector<16x1xf32>
    %46 = vector.broadcast %45 : vector<16x1xf32> to vector<16x35xf32>
    %47 = arith.divf %43, %46 : vector<16x35xf32>
    %c0_i32_15 = arith.constant 0 : i32
    %48 = vector.broadcast %c0_i32_15 : i32 to vector<16x35xi32>
    %49 = arith.cmpi eq, %38, %48 : vector<16x35xi32>
    %c32_i32 = arith.constant 32 : i32
    %50 = vector.broadcast %c32_i32 : i32 to vector<16x35xi32>
    %51 = arith.cmpi sge, %38, %50 : vector<16x35xi32>
    %52 = arith.ori %49, %51 : vector<16x35xi1>
    %cst_16 = arith.constant -1.000000e+00 : f32
    %53 = vector.broadcast %cst_16 : f32 to vector<16x35xf32>
    %54 = arith.select %52, %53, %47 : vector<16x35xi1>, vector<16x35xf32>
    %cst_17 = arith.constant dense<0xFF800000> : vector<16xf32>
    %55 = vector.multi_reduction <maximumf>, %54, %cst_17 [1] : vector<16x35xf32> to vector<16xf32>
    %56 = vector.shape_cast %55 : vector<16xf32> to vector<16x1xf32>
    %57 = vector.broadcast %56 : vector<16x1xf32> to vector<16x35xf32>
    %58 = arith.cmpf oeq, %54, %57 : vector<16x35xf32>
    %c35_i32 = arith.constant 35 : i32
    %59 = vector.broadcast %c35_i32 : i32 to vector<16x35xi32>
    %60 = arith.select %58, %38, %59 : vector<16x35xi1>, vector<16x35xi32>
    %cst_18 = arith.constant dense<2147483647> : vector<16xi32>
    %61 = vector.multi_reduction <minsi>, %60, %cst_18 [1] : vector<16x35xi32> to vector<16xi32>
    %62 = vector.shape_cast %61 : vector<16xi32> to vector<16x1xi32>
    %63 = arith.sitofp %62 : vector<16x1xi32> to vector<16x1xf32>
    %c0_19 = arith.constant 0 : index
    %c0_20 = arith.constant 0 : index
    %c0_21 = arith.constant 0 : index
    %64 = vector.load %arg4[%c0_19, %c0_20, %c0_21] : memref<1x16x2xi32, #tpu.memory_space<vmem>>, vector<1x16x2xi32>
    %65 = vector.shape_cast %64 : vector<1x16x2xi32> to vector<16x2xi32>
    %66 = tpu.iota {dimensions = array<i32: 1>} : vector<16x8xi32>
    %67 = vector.extract_strided_slice %65 {offsets = [0, 0], sizes = [16, 1], strides = [1, 1]} : vector<16x2xi32> to vector<16x1xi32>
    %68 = vector.broadcast %67 : vector<16x1xi32> to vector<16x8xi32>
    %69 = arith.cmpi eq, %66, %68 : vector<16x8xi32>
    %70 = arith.extui %69 : vector<16x8xi1> to vector<16x8xi32>
    %71 = arith.sitofp %70 : vector<16x8xi32> to vector<16x8xf32>
    %72 = vector.extract_strided_slice %65 {offsets = [0, 1], sizes = [16, 1], strides = [1, 1]} : vector<16x2xi32> to vector<16x1xi32>
    %73 = vector.broadcast %72 : vector<16x1xi32> to vector<16x8xi32>
    %74 = arith.cmpi eq, %66, %73 : vector<16x8xi32>
    %75 = arith.extui %74 : vector<16x8xi1> to vector<16x8xi32>
    %76 = arith.sitofp %75 : vector<16x8xi32> to vector<16x8xf32>
    %77 = tpu.concatenate %71, %76 in 0 : vector<16x8xf32>, vector<16x8xf32> -> vector<32x8xf32>
    %cst_22 = arith.constant dense<0.000000e+00> : vector<32x1xf32>
    %78 = tpu.matmul %77, %17, %cst_22 {dimension_numbers = #tpu.dot_dimension_numbers<[1], [0], [0], [1], [0, 0, 1, 1], [], []>} : vector<32x8xf32>, vector<8x1xf32>, vector<32x1xf32> -> vector<32x1xf32>
    %79 = vector.extract_strided_slice %78 {offsets = [0, 0], sizes = [16, 1], strides = [1, 1]} : vector<32x1xf32> to vector<16x1xf32>
    %80 = arith.mulf %56, %79 : vector<16x1xf32>
    %81 = vector.extract_strided_slice %78 {offsets = [16, 0], sizes = [16, 1], strides = [1, 1]} : vector<32x1xf32> to vector<16x1xf32>
    %82 = arith.mulf %80, %81 : vector<16x1xf32>
    %c32_i32_23 = arith.constant 32 : i32
    %83 = vector.broadcast %c32_i32_23 : i32 to vector<16x35xi32>
    %84 = arith.cmpi eq, %38, %83 : vector<16x35xi32>
    %c33_i32 = arith.constant 33 : i32
    %85 = vector.broadcast %c33_i32 : i32 to vector<16x35xi32>
    %86 = arith.cmpi eq, %38, %85 : vector<16x35xi32>
    %c34_i32 = arith.constant 34 : i32
    %87 = vector.broadcast %c34_i32 : i32 to vector<16x35xi32>
    %88 = arith.cmpi eq, %38, %87 : vector<16x35xi32>
    %89 = vector.shape_cast %82 : vector<16x1xf32> to vector<16x1xf32>
    %90 = vector.broadcast %89 : vector<16x1xf32> to vector<16x35xf32>
    %91 = arith.select %88, %90, %47 : vector<16x35xi1>, vector<16x35xf32>
    %92 = vector.shape_cast %63 : vector<16x1xf32> to vector<16x1xf32>
    %93 = vector.broadcast %92 : vector<16x1xf32> to vector<16x35xf32>
    %94 = arith.select %86, %93, %91 : vector<16x35xi1>, vector<16x35xf32>
    %95 = vector.shape_cast %56 : vector<16x1xf32> to vector<16x1xf32>
    %96 = vector.broadcast %95 : vector<16x1xf32> to vector<16x35xf32>
    %97 = arith.select %84, %96, %94 : vector<16x35xi1>, vector<16x35xf32>
    %c0_24 = arith.constant 0 : index
    %c0_25 = arith.constant 0 : index
    %c0_26 = arith.constant 0 : index
    %98 = vector.load %arg6[%c0_24, %c0_25, %c0_26] : memref<1x16x35xf32, #tpu.memory_space<vmem>>, vector<1x16x35xf32>
    %99 = vector.shape_cast %98 : vector<1x16x35xf32> to vector<16x35xf32>
    %100 = vector.shape_cast %97 : vector<16x35xf32> to vector<1x16x35xf32>
    tpu.vector_store %arg6[%c0_24, %c0_25, %c0_26], %100 {strides = array<i32>} : memref<1x16x35xf32, #tpu.memory_space<vmem>>, vector<1x16x35xf32>,
    return
  }
  func.func @transform_0(%arg0: i32, %arg1: i32) -> (i32, i32, i32) {
    %c0_i32 = arith.constant 0 : i32
    %c0_i32_0 = arith.constant 0 : i32
    %c0_i32_1 = arith.constant 0 : i32
    return %arg0, %c0_i32, %c0_i32_0 : i32, i32, i32
  }
  func.func @transform_1(%arg0: i32, %arg1: i32) -> (i32, i32, i32) {
    %c0_i32 = arith.constant 0 : i32
    %c0_i32_0 = arith.constant 0 : i32
    return %arg0, %arg1, %c0_i32 : i32, i32, i32
  }
  func.func @transform_2(%arg0: i32, %arg1: i32) -> (i32, i32, i32) {
    %c0_i32 = arith.constant 0 : i32
    %c0_i32_0 = arith.constant 0 : i32
    return %arg0, %arg1, %c0_i32 : i32, i32, i32
  }
  func.func @transform_3(%arg0: i32, %arg1: i32) -> (i32, i32, i32) {
    %c0_i32 = arith.constant 0 : i32
    %c0_i32_0 = arith.constant 0 : i32
    %c0_i32_1 = arith.constant 0 : i32
    return %arg0, %c0_i32, %c0_i32_0 : i32, i32, i32
  }
  func.func @transform_4(%arg0: i32, %arg1: i32) -> (i32, i32, i32) {
    %c0_i32 = arith.constant 0 : i32
    %c0_i32_0 = arith.constant 0 : i32
    return %arg0, %arg1, %c0_i32 : i32, i32, i32
  }
}

</mosaic_0001>

<bundles_post_ra>
// kernel: _batched_postprocess.1
= control target key start
LH: loop header
LB: loop body
LE: loop exit
PB: predicated region body
PF: predicated region fallthrough
CT: control target
= control target key end

     0   :  { %10 = vsyncpa [#allocation3], 0  ;;  %s1200_s0 = inlined_call_operand.hbm [shape: f32[2,8,16], index: 0, kind: input, shape index: {}]   ;;  %s1201_s1 = inlined_call_operand.vmem [shape: f32[2,16,35], index: 1, kind: input, shape index: {}]   ;;  %s1202_s2 = inlined_call_operand.vmem [shape: s32[2,16,2], index: 2, kind: input, shape index: {}]   ;;  %s1203_s3 = inlined_call_operand.vmem [shape: f32[2,8,2], index: 3, kind: output, shape index: {0}]   ;;  %s1204_s4 = inlined_call_operand.vmem [shape: f32[2,16,35], index: 4, kind: output, shape index: {1}]  }
   0x1   :  { %12 = vsyncpa [#allocation3 + $0x1], 0  ;;  %s969_s15 = smov 0   ;;  %s971_s16 = smov 0  }
   0x2   :  { %s973_s17 = smov 0   ;;  %s975_s18 = smov 0  }
   0x3   :  { %s977_s19 = smov 0   ;;  %s979_s20 = smov 0  }
   0x4 LB: > { %s741_s21 = sadd.s32 4294967295, %s938_s20   ;;  %s30_s22 = sadd.s32 1, %s934_s19  ;;  %s938_s20 = sphi %s979_s20, %s18_s20   ;;  %s934_s19 = sphi %s977_s19, %s1216_s19   ;;  %s930_s18 = sphi %s975_s18, %s1215_s18   ;;  %s926_s17 = sphi %s973_s17, %s1214_s17   ;;  %s922_s16 = sphi %s971_s16, %s1213_s16   ;;  %s918_s15 = sphi %s969_s15, %s1212_s15  }
   0x5   : > { %p32_p0 = scmp.ge.s32.totalorder %s30_s22, 2  ;;  %s37_s23 = sadd.s32 1, %s926_s17 }
   0x6   : > { %p44_p1 = scmp.ne.s32.totalorder %s926_s17, %s922_s16  ;;  %p45_p2 = scmp.eq.s32.totalorder %s938_s20, 0 }
   0x7   : > { %s1218_s22 = smov (%p32_p0, %s30_s22), 0  ;;  %p50_p4 = scmp.ne.s32.totalorder %s922_s16, %s918_s15 }
   0x8   : > { %p1005_p3 = por %p45_p2, %p44_p1  ;;  %s34_s25 = ssub.s32 %s934_s19, %s1218_s22 }
   0x9   : > { %p51_p5 = scmp.eq.s32.totalorder %s741_s21, 0  ;;  %p35_p6 = scmp.eq.s32.totalorder %s34_s25, 0 }
   0xa   : > { %p790_p8 = scmp.lt.s32.totalorder %s938_s20, 2  ;;  %s184_s28 = sand.u32 1, %s926_s17  }
   0xb   : > { %p1012_p7 = por %p51_p5, %p50_p4  ;;  %s746_s29 = sshll.u32 %s934_s19, 7 }
   0xc   : > { %s1018_s27 = scalar_select %p35_p6, %s926_s17, %s37_s23  }
   0xd   : > { %s745_s30 = sshll.u32 %s184_s28, 3  ;;  %s1025_s7 = scalar_lea.hbm %s1200_s0, %s746_s29 }
   0xe   : > { %s188_s8 = scalar_lea.vmem [#allocation2], %s745_s30  ;;  %p1029_p9 = pnand %p790_p8, %p1005_p3 }
   0xf   : > { %s195_s9 = sshll.u32 %s188_s8, 4  ;;  %s185_s11 = scalar_lea.sflag [#allocation3], %s184_s28  ;;  %s1033_s9 = int_to_ptr.vmem [resolvable:$true] %s195_s9 }
  0x10   : > { %s858_s12 = scalar_lea.hbm %s1025_s7, 128  ;;  %p860_p13 = pneg %p1029_p9 }
  0x11   : > { %p859_p12 = scmp.ne.s32.totalorder %s1025_s7, %s858_s12  ;;  %s863_s15 = scalar_lea.hbm %s1200_s0, 256 }
  0x12   : > { %p864_p2 = scmp.lt.u32.totalorder %s1025_s7, %s1200_s0  ;;  %p865_p3 = scmp.lt.u32.totalorder %s863_s15, %s858_s12 }
  0x13   : > { %p861_p0 = pnand %p860_p13, %p859_p12  ;;  %p867_p5 = scmp.lt.u32.totalorder %s858_s12, %s1025_s7 }
  0x14   : > { %p866_p4 = por %p865_p3, %p864_p2 }
  0x15   : > { %p862_p1 = pneg %p861_p0 }
  0x16   : > { %p868_p6 = por %p867_p5, %p866_p4 }
  0x18   : > { %p869_p8 = pnand %p868_p6, %p862_p1 }
  0x1a   : > { %872 = shalt.err (!%p869_p8)
}
  0x1b   : > { %s873_s24 = scalar_lea.vmem %s1033_s9, 128  ;;  %s940_s25 = smov [#allocation2]  }
  0x1c   : > { %p874_p12 = scmp.ne.s32.totalorder %s1033_s9, %s873_s24  ;;  %s878_s28 = sshll.u32 %s940_s25, 4  ;;  %s879_s28 = int_to_ptr.vmem [resolvable:$false] %s878_s28 }
  0x1d   : > { %s880_s29 = scalar_lea.vmem %s879_s28, 256  ;;  %p881_p11 = scmp.lt.s32.totalorder %s1033_s9, %s879_s28 }
  0x1e   : > { %p876_p0 = pnand %p874_p12, %p860_p13  ;;  %p882_p2 = scmp.lt.s32.totalorder %s880_s29, %s873_s24 }
  0x20   : > { %p877_p10 = pneg %p876_p0  ;;  %p883_p3 = por %p882_p2, %p881_p11 }
  0x22   : > { %p884_p4 = pnand %p883_p3, %p877_p10 }
  0x24   : > { %887 = shalt.err (!%p884_p4)
}
  0x25   : > { %789 = dma.hbm_to_vmem [thread:$0]  (!%p1029_p9), %s1025_s7, 128, %s1033_s9, %s185_s11  }
  0x26   : > { %p1208_p1 = scmp.lt.s32.totalorder %s938_s20, 3  ;;  %p1209_p5 = scmp.ge.s32.totalorder %s938_s20, 1 }
  0x28   : > { %p227_p13 = pnand %p1209_p5, %p1208_p1 }
  0x29   : > { %s232_s30 = sand.u32 (!%p227_p13), 1, %s922_s16  }
  0x2a   : > { %230 = sbr.rel (%p227_p13) target bundleno = 1034 (0x40a), region = 32  ;;  %s748_s5 = sshll.u32 (!%p227_p13), %s232_s30, 3 }
  0x2b   : > { %s233_s6 = scalar_lea.sflag (!%p227_p13), [#allocation3], %s232_s30  ;;  %s236_s8 = scalar_lea.vmem (!%p227_p13), [#allocation2], %s748_s5 }
  0x31   : > { %913 = dma.done.wait (%p1012_p7), %s233_s6, 128  }
  0x32   : > { %915 = vsyncadd (%p1012_p7), %s233_s6, 4294967168  ;;  %p288_p10 = scmp.lt.s32.totalorder %s930_s18, 1  ;;  %v941_v0 = vmov 0   ;;  %vm364_vm0 = vcmask 285696   ;;  %vm324_vm1 = vcmask 130048   ;;  %v321_v2 = vld [vmem:[%s236_s8] sm:$0xff]  ;;  %v322_v22 = vlaneseq }
  0x33   : > { %842 = vset.pattern.permute.xlu1 %v941_v0  ;;  %843 = vset.pattern.permute.xlu0 %v941_v0  ;;  %v325_v5 = vsel %vm324_vm1, %v321_v2, -inf  ;;  %v942_v8 = vmov 1   ;;  %v943_v25 = vmov 0.0   ;;  %vm459_vm4 = vcmask 64512  }
  0x34   : > { %s1220_s18 = smov (!%p288_p10, %s930_s18), 1  ;;  %326 = vmax.xlane.f32.xlu0 %v325_v5  ;;  %v1094_v23 = vand.u32 127, %v322_v22 }
  0x35   : > { %s1076_s7 = sshll.u32 %s1220_s18, 4  ;;  %s753_s23 = sshll.u32 %s1220_s18, 3 }
  0x36   : > { %s295_s11 = scalar_lea.vmem %s1201_s1, %s1076_s7  ;;  %s305_s13 = scalar_lea.vmem %s1202_s2, %s1076_s7  ;;  %vm336_vm5 = vcmp.eq.s32.totalorder %v1094_v23, 0  ;;  %vm387_vm6 = vcmp.ge.s32.totalorder %v1094_v23, 32 }
  0x37   : > { %v362_v1 = vld [vmem:[%s295_s11] sm:$0xff]  ;;  %v1082_v3 = vld [vmem:[%s295_s11 + $0x8] sm:$0xff]  ;;  %vm1104_vm7 = vmor %vm336_vm5, %vm387_vm6  ;;  %s319_s21 = scalar_lea.vmem %s1204_s4, %s1076_s7  ;;  %s310_s28 = scalar_lea.vmem %s1203_s3, %s753_s23 }
  0x38   : > { %v365_v4 = vsel %vm364_vm0, %v362_v1, -inf  ;;  %v368_v6 = vsel %vm364_vm0, %v1082_v3, -inf  ;;  %v433_v7 = vld [vmem:[%s305_s13] sm:$0xff]  ;;  %v434_v9 = vld [vmem:[%s305_s13 + $0x8] sm:$0xff] }
  0x39   : > { %366 = vmax.xlane.f32.xlu1 %v365_v4 }
  0x3d   : > { %369 = vmax.xlane.f32.xlu1 %v368_v6 }
  0x4e   : > { %436 = vperm.xlu1 %842, %v433_v7  }
  0x52   : > { %844 = vset.pattern.permute.xlu1 %v942_v8 }
  0x53   : > { %448 = vperm.xlu1 %844, %v433_v7  }
  0x57   : > { %451 = vperm.xlu1 %844, %v434_v9  }
  0x5b   : > { %845 = vset.pattern.permute.xlu1 %v941_v0 }
  0xc1   : > { %v327_v11 = vpop.xlane.xlu0 %326 }
  0xc2   : > { %v328_v13 = vsub.f32 %v321_v2, %v327_v11 }
  0xc4   : > { %v329_v15 = vmul.f32 1.442695, %v328_v13 }
  0xc6   : > { %v367_v10 = vpop.xlane.xlu1 %366 }
  0xc7   : > { %v371_v12 = vsub.f32 %v362_v1, %v367_v10 }
  0xc9   : > { %v373_v14 = vmul.f32 1.442695, %v371_v12 }
  0xca   : > { %v370_v20 = vpop.xlane.xlu1 %369 }
  0xcb   : > { %846 = vpow2.f32 %v373_v14  ;;  %v372_v40 = vsub.f32 %v1082_v3, %v370_v20 }
  0xcc   : > { %848 = vpow2.f32 %v329_v15 }
  0xcd   : > { %v375_v41 = vmul.f32 1.442695, %v372_v40 }
  0xce   : > { %v437_v21 = vpop.permute.xlu1 %436 }
  0xcf   : > { %vm441_vm2 = vcmp.eq.s32.totalorder %v1094_v23, %v437_v21 }
  0xd0   : > { %v756_v26 = vsel %vm441_vm2, 1.0, %v943_v25  ;;  %vm562_vm2 = vcmp.eq.s32.totalorder %v1094_v23, 33 }
  0xd1   : > { %776 = vmatprep.mubr.msk.f32.mxu0 %vm459_vm4, %v756_v26 }
  0xd2   : > { %v449_v24 = vpop.permute.xlu1 %448 }
  0xd3   : > { %vm453_vm3 = vcmp.eq.s32.totalorder %v1094_v23, %v449_v24 }
  0xd4   : > { %v758_v27 = vsel %vm453_vm3, 1.0, %v943_v25  ;;  %vm561_vm3 = vcmp.eq.s32.totalorder %v1094_v23, 32 }
  0xd5   : > { %v847_v16 = vpop.eup %846  ;;  %779 = vmatprep.mubr.msk.f32.mxu1 %vm459_vm4, %v758_v27 }
  0xd6   : > { %v849_v17 = vpop.eup %848  ;;  %v377_v18 = vsel %vm364_vm0, %v847_v16, 0.0  ;;  %v452_v28 = vpop.permute.xlu1 %451 }
  0xd7   : > { %378 = vadd.xlane.f32.xlu1 %v377_v18  ;;  %v331_v19 = vsel %vm324_vm1, %v849_v17, 0.0  ;;  %vm454_vm8 = vcmp.eq.s32.totalorder %v1094_v23, %v452_v28 }
  0xd8   : > { %332 = vadd.xlane.f32.xlu0 %v331_v19  ;;  %v759_v45 = vsel %vm454_vm8, 1.0, %v943_v25 }
 0x164   : > { %v379_v29 = vpop.xlane.xlu1 %378 }
 0x165   : > { %850 = vrcp.f32 %v379_v29  ;;  %v333_v30 = vpop.xlane.xlu0 %332 }
 0x166   : > { %852 = vrcp.f32 %v333_v30 }
 0x167   : > { %854 = vpow2.f32 %v375_v41 }
 0x16f   : > { %v851_v31 = vpop.eup %850 }
 0x170   : > { %v853_v33 = vpop.eup %852  ;;  %v1108_v34 = vmul.f32 %v851_v31, %v847_v16 }
 0x171   : > { %v335_v35 = vmul.f32 %v853_v33, %v849_v17  ;;  %v855_v42 = vpop.eup %854 }
 0x172   : > { %v389_v36 = vsel %vm1104_vm7, -1.0, %v1108_v34  ;;  %v380_v43 = vsel %vm364_vm0, %v855_v42, 0.0 }
 0x173   : > { %v391_v37 = vsel %vm364_vm0, %v389_v36, -inf  ;;  %v337_v38 = vsel %vm336_vm5, -1.0, %v335_v35 }
 0x174   : > { %392 = vmax.xlane.f32.xlu1 %v391_v37  ;;  %v338_v39 = vsel %vm324_vm1, %v337_v38, -inf }
 0x175   : > { %339 = vmax.xlane.f32.xlu0 %v338_v39 }
 0x18b   : > { %439 = vperm.xlu0 %843, %v434_v9  }
 0x1aa   : > { %381 = vadd.xlane.f32.xlu0 %v380_v43 }
 0x201   : > { %v1129_v49 = vpop.xlane.xlu1 %392 }
 0x202   : > { %v1120_v44 = vpop.xlane.xlu0 %339  ;;  %vm397_vm10 = vcmp.eq.f32.partialorder %v389_v36, %v1129_v49 }
 0x203   : > { %774 = vmatprep.subr.mxu0 %v1120_v44  ;;  %782 = vmatprep.subr.mxu1 %v1120_v44  ;;  %v399_v50 = vsel %vm397_vm10, %v1094_v23, 35  ;;  %vm341_vm11 = vcmp.eq.f32.partialorder %v337_v38, %v1120_v44 }
 0x204   : > { %775 = vmatpush3.msra.mxu0 %v1120_v44  ;;  %783 = vmatpush3.msra.mxu1 %v1120_v44  ;;  %v401_v52 = vsel %vm364_vm0, %v399_v50, 2147483647  ;;  %v342_v60 = vsel %vm341_vm11, %v1094_v23, 16 }
 0x205   : > { %780 = vmatmul.mubr.msk.f32.vlgmr.msra.gmra.mrb[0].mxu1 %vm459_vm4, %v759_v45  ;;  %v403_v55 = vshra.s32 %v401_v52, 16  ;;  %v402_v59 = vand.u32 65535, %v401_v52  ;;  %v343_v63 = vsel %vm324_vm1, %v342_v60, 2147483647  ;;  %vm563_vm1 = vcmp.eq.s32.totalorder %v1094_v23, 34 }
 0x206   : > { %v345_v7 = vshra.s32 %v343_v63, 16  ;;  %v344_v18 = vand.u32 65535, %v343_v63 }
 0x207   : > { %v405_v57 = vcvt.s32.f32 %v403_v55  ;;  %v404_v2 = vcvt.s32.f32 %v402_v59 }
 0x208   : > { %v347_v8 = vcvt.s32.f32 %v345_v7  ;;  %v346_v21 = vcvt.s32.f32 %v344_v18 }
 0x20a   : > { %v440_v46 = vpop.permute.xlu0 %439 }
 0x20b   : > { %vm442_vm9 = vcmp.eq.s32.totalorder %v1094_v23, %v440_v46 }
 0x20c   : > { %v757_v47 = vsel %vm442_vm9, 1.0, %v943_v25 }
 0x20d   : > { %777 = vmatmul.mubr.msk.f32.vlgmr.msra.gmra.mrb[0].mxu0 %vm459_vm4, %v757_v47  ;;  %vm360_vm4 = vcmask 15360  }
 0x237   : > { %v382_v48 = vpop.xlane.xlu0 %381 }
 0x238   : > { %856 = vrcp.f32 %v382_v48 }
 0x242   : > { %v857_v51 = vpop.eup %856 }
 0x243   : > { %v1134_v53 = vmul.f32 %v857_v51, %v855_v42 }
 0x245   : > { %v390_v54 = vsel %vm1104_vm7, -1.0, %v1134_v53 }
 0x246   : > { %v394_v56 = vsel %vm364_vm0, %v390_v54, -inf }
 0x247   : > { %395 = vmax.xlane.f32.xlu1 %v394_v56 }
 0x24b   : > { %406 = vmin.xlane.f32.xlu1 %v405_v57 }
 0x2d4   : > { %v1141_v58 = vpop.xlane.xlu1 %395 }
 0x2d5   : > { %vm398_vm12 = vcmp.eq.f32.partialorder %v390_v54, %v1141_v58 }
 0x2d6   : > { %v400_v61 = vsel %vm398_vm12, %v1094_v23, 35 }
 0x2d7   : > { %v416_v62 = vsel %vm364_vm0, %v400_v61, 2147483647 }
 0x2d8   : > { %v781_v0 = vpop.f32.mrb[0].mxu1  ;;  %v407_v1 = vpop.xlane.xlu1 %406  ;;  %v418_v3 = vshra.s32 %v416_v62, 16  ;;  %v417_v15 = vand.u32 65535, %v416_v62 }
 0x2d9   : > { %v548_v4 = vpop.f32.mrb[1].mxu1  ;;  %vm408_vm13 = vcmp.eq.f32.partialorder %v405_v57, %v407_v1  ;;  %v413_v25 = vcvt.f32.s32 %v407_v1 }
 0x2da   : > { %v409_v5 = vsel %vm408_vm13, %v404_v2, inf  ;;  %v420_v6 = vcvt.s32.f32 %v418_v3  ;;  %v419_v17 = vcvt.s32.f32 %v417_v15 }
 0x2db   : > { %410 = vmin.xlane.f32.xlu0 %v409_v5  ;;  %v414_v27 = vshll.u32 %v413_v25, 16 }
 0x2dc   : > { %421 = vmin.xlane.f32.xlu1 %v420_v6 }
 0x2e0   : > { %v778_v9 = vpop.f32.mrb[0].mxu0  ;;  %348 = vmin.xlane.f32.xlu1 %v347_v8 }
 0x2e1   : > { %v558_v10 = vmul.f32 %v778_v9, %v1141_v58  ;;  %v538_v11 = vpop.f32.mrb[1].mxu0 }
 0x2e2   : > { %v557_v12 = vmul.f32 %v538_v11, %v1129_v49 }
 0x2e3   : > { %v560_v13 = vmul.f32 %v781_v0, %v558_v10 }
 0x2e4   : > { %v559_v14 = vmul.f32 %v557_v12, %v548_v4 }
 0x368   : > { %v411_v24 = vpop.xlane.xlu0 %410 }
 0x369   : > { %v422_v16 = vpop.xlane.xlu1 %421  ;;  %v412_v26 = vcvt.f32.s32 %v411_v24 }
 0x36a   : > { %vm423_vm14 = vcmp.eq.f32.partialorder %v420_v6, %v422_v16  ;;  %v428_v31 = vcvt.f32.s32 %v422_v16 }
 0x36b   : > { %v424_v19 = vsel %vm423_vm14, %v419_v17, inf  ;;  %v415_v28 = vadd.s32 %v414_v27, %v412_v26 }
 0x36c   : > { %425 = vmin.xlane.f32.xlu1 %v424_v19  ;;  %v429_v40 = vshll.u32 %v428_v31, 16 }
 0x36d   : > { %v349_v20 = vpop.xlane.xlu1 %348  ;;  %v431_v32 = vcvt.s32.f32 %v415_v28 }
 0x36e   : > { %vm350_vm15 = vcmp.eq.f32.partialorder %v347_v8, %v349_v20  ;;  %v355_v30 = vcvt.f32.s32 %v349_v20 }
 0x36f   : > { %v351_v22 = vsel %vm350_vm15, %v346_v21, inf }
 0x370   : > { %352 = vmin.xlane.f32.xlu0 %v351_v22  ;;  %v356_v37 = vshll.u32 %v355_v30, 16 }
 0x37d   : > { %566 = vperm.xlu1 %845, %v559_v14  }
 0x386   : > { %571 = vperm.xlu0 %843, %v560_v13  }
 0x3f9   : > { %v426_v29 = vpop.xlane.xlu1 %425 }
 0x3fa   : > { %v427_v33 = vcvt.f32.s32 %v426_v29 }
 0x3fc   : > { %v430_v45 = vadd.s32 %v429_v40, %v427_v33 }
 0x3fd   : > { %v353_v35 = vpop.xlane.xlu0 %352  ;;  %v567_v36 = vpop.permute.xlu1 %566 }
 0x3fe   : > { %v354_v38 = vcvt.f32.s32 %v353_v35  ;;  %v574_v39 = vsel %vm563_vm1, %v567_v36, %v1108_v34  ;;  %v432_v47 = vcvt.s32.f32 %v430_v45 }
 0x3ff   : > { %v576_v41 = vsel %vm562_vm2, %v431_v32, %v574_v39 }
 0x400   : > { %v357_v42 = vadd.s32 %v356_v37, %v354_v38  ;;  %v578_v43 = vsel %vm561_vm3, %v1129_v49, %v576_v41 }
 0x401   : > { %580 = vst.msk [vmem:[%s319_s21] sm:$0xff] %vm364_vm0, %v578_v43 }
 0x402   : > { %v358_v46 = vcvt.s32.f32 %v357_v42 }
 0x404   : > { %v359_v34 = vsel %vm336_vm5, %v1120_v44, %v358_v46 }
 0x405   : > { %361 = vst.msk [vmem:[%s310_s28] sm:$0xff] %vm360_vm4, %v359_v34  ;;  %v572_v48 = vpop.permute.xlu0 %571 }
 0x406   : > { %v575_v49 = vsel %vm563_vm1, %v572_v48, %v1134_v53 }
 0x407   : > { %v577_v50 = vsel %vm562_vm2, %v432_v47, %v575_v49 }
 0x408   : > { %v579_v51 = vsel %vm561_vm3, %v1141_v58, %v577_v50 }
 0x409   : > { %581 = vst.msk [vmem:[%s319_s21 + $0x8] sm:$0xff] %vm364_vm0, %v579_v51 }
 0x40a PF: > { %s18_s20 = sadd.s32 1, %s938_s20   ;;  %s1212_s15 = smov %s922_s16 }
 0x40b   : > { %p15_p7 = scmp.ge.s32.totalorder %s18_s20, 4   ;;  %s1213_s16 = smov %s926_s17 }
 0x40c   : > { %s1214_s17 = smov %s1018_s27  ;;  %s1215_s18 = smov %s934_s19 }
 0x40d   : > { %s1216_s19 = smov %s1218_s22  ;;  %17 = sbr.rel (!%p15_p7) target bundleno = 4 (0x4), region = 90 }
 0x414   :  { %626 = vsyncpa [#allocation3], 1 }
 0x415   :  { %628 = vsyncpa [#allocation3 + $0x1], 1 }

</bundles_post_ra>
